<compile_context>
chip_gen: v7x
topology: tpu7x:2x2x1
jax: 0.10.0
libtpu: 0.0.40
codegen_flags: <defaults>
</compile_context>

<pallas_src>
import functools

import jax
import jax.numpy as jnp
from jax.experimental import pallas as pl
from jax.experimental.pallas import tpu as pltpu


def _mlp_channel_weights_kernel(
    x1_ref, x2_ref,                       # (dim, tile_hw) streamed tiles
    w1_ref,                               # (4*dim, hidden)
    b1_ref,                               # (1, hidden)
    w2_ref,                               # (hidden, 2*dim)
    b2_ref,                               # (1, 2*dim)
    o_ref,                                # (1, 2*dim) lane-dense output row
    sum1_ref, max1_ref, sum2_ref, max2_ref,   # (dim, 128) f32 scratch
    *, dim, hw, tile_hw):
    k = pl.program_id(1)
    nk = pl.num_programs(1)
    chunked = (tile_hw % 128 == 0)        # static; else tile_hw == hw and nk == 1
    inv_hw = 1.0 / float(hw)

    if chunked:
        n_chunks = tile_hw // 128
        rem = hw % tile_hw                # valid lanes in the (ragged) last tile

        # dim (sublane) blocking: bounds accumulator register live range.
        if dim <= 64:
            dblk = dim
        elif dim % 64 == 0:
            dblk = 64
        elif dim % 32 == 0:
            dblk = 32
        elif dim % 8 == 0:
            dblk = 8
        else:
            dblk = dim
        n_db = dim // dblk

        # ---- init running sum / max (once per batch row) ---------------------
        @pl.when(k == 0)
        def _init():
            sum1_ref[...] = jnp.zeros_like(sum1_ref)
            sum2_ref[...] = jnp.zeros_like(sum2_ref)
            max1_ref[...] = jnp.full_like(max1_ref, -jnp.inf)
            max2_ref[...] = jnp.full_like(max2_ref, -jnp.inf)

        # ---- streaming pooling: per-chunk reads, dim-blocked accumulation ----
        def accumulate(x_ref, s_ref, m_ref, *, masked):
            if masked:
                n_full = rem // 128       # fully-valid 128-lane chunks
                partial = rem % 128       # valid lanes in the one partial chunk
            else:
                n_full, partial = n_chunks, 0
            for db in range(n_db):
                d0 = db * dblk
                s = s_ref[d0:d0 + dblk, :]
                m = m_ref[d0:d0 + dblk, :]
                for c in range(n_full):
                    xc = x_ref[d0:d0 + dblk, c * 128:(c + 1) * 128]
                    s = s + xc
                    m = jnp.maximum(m, xc)
                if partial:
                    # Only the single partial chunk is masked; chunks fully past
                    # `hw` are never read (0 for the sum, -inf for the max).
                    xc = x_ref[d0:d0 + dblk, n_full * 128:(n_full + 1) * 128]
                    lane = jax.lax.broadcasted_iota(jnp.int32, (1, 128), 1)
                    valid = lane < partial
                    s = s + jnp.where(valid, xc, 0.0)
                    m = jnp.maximum(m, jnp.where(valid, xc, -jnp.inf))
                s_ref[d0:d0 + dblk, :] = s
                m_ref[d0:d0 + dblk, :] = m

        if rem == 0:
            accumulate(x1_ref, sum1_ref, max1_ref, masked=False)
            accumulate(x2_ref, sum2_ref, max2_ref, masked=False)
        else:
            @pl.when(k < nk - 1)
            def _full_tiles():
                accumulate(x1_ref, sum1_ref, max1_ref, masked=False)
                accumulate(x2_ref, sum2_ref, max2_ref, masked=False)

            @pl.when(k == nk - 1)
            def _ragged_tile():
                accumulate(x1_ref, sum1_ref, max1_ref, masked=True)
                accumulate(x2_ref, sum2_ref, max2_ref, masked=True)

    # ---- epilogue: one cross-lane reduce + tiny row-form MLP, per batch row --
    @pl.when(k == nk - 1)
    def _finalize():
        if chunked:
            avg1 = jnp.sum(sum1_ref[...], axis=-1, keepdims=True) * inv_hw  # (dim,1)
            mx1 = jnp.max(max1_ref[...], axis=-1, keepdims=True)
            avg2 = jnp.sum(sum2_ref[...], axis=-1, keepdims=True) * inv_hw
            mx2 = jnp.max(max2_ref[...], axis=-1, keepdims=True)
        else:
            # Single full-extent spatial block (nk == 1): reduce it directly.
            x1t = x1_ref[...]
            x2t = x2_ref[...]
            avg1 = jnp.sum(x1t, axis=-1, keepdims=True) * inv_hw
            mx1 = jnp.max(x1t, axis=-1, keepdims=True)
            avg2 = jnp.sum(x2t, axis=-1, keepdims=True) * inv_hw
            mx2 = jnp.max(x2t, axis=-1, keepdims=True)

        # Pooled features as one lane-dense row, ordered like the reference:
        # [avg(x1), avg(x2), max(x1), max(x2)].
        y_col = jnp.concatenate([avg1, avg2, mx1, mx2], axis=0)   # (4*dim, 1)
        y_row = jnp.transpose(y_col)                              # (1, 4*dim)

        h = jnp.dot(y_row, w1_ref[...], preferred_element_type=jnp.float32)
        h = jnp.maximum(h + b1_ref[...], 0.0)                     # ReLU, (1, hidden)
        out = jnp.dot(h, w2_ref[...], preferred_element_type=jnp.float32) + b2_ref[...]
        o_ref[...] = jax.nn.sigmoid(out).astype(o_ref.dtype)      # (1, 2*dim)


def _choose_tile_hw(hw, dim, budget_bytes=4 << 20):
    """Spatial (lane) tile width, sized by a byte budget (no hard lane cap).

    * Whole spatial extent in one block when it fits the budget (no ragged
      tiles, one grid step per batch row).
    * Otherwise a multiple of 128 lanes targeting ~budget_bytes per f32 tile
      (2k-8k lanes for small dim), capped at 8192 lanes.
    """
    if hw < 128 or hw * dim * 4 <= budget_bytes:
        return hw
    lanes = (budget_bytes // (4 * dim)) // 128 * 128
    lanes = int(max(128, min(8192, lanes)))
    return min(lanes, (hw // 128) * 128)


def _resident_spec(shape):
    """BlockSpec for a constant-index (weight/bias) block.

    These blocks never change across the grid, so request a single buffer
    (no double-buffering) when the running JAX supports pipeline_mode.
    """
    index_map = lambda b, k: (0,) * len(shape)
    try:
        return pl.BlockSpec(shape, index_map, pipeline_mode=pl.Buffered(1))
    except Exception:  # pipeline_mode / Buffered unavailable -> default buffering
        return pl.BlockSpec(shape, index_map)


def mlp_channel_weights(x1, x2, params, dim, *, tile_hw=None):
    """Pallas equivalent of MLPChannelWeights.forward.

    x1, x2: (B, dim, H, W) float32 (NCHW, matching the PyTorch module)
    returns: (2, B, dim, 1, 1) float32
    """
    B, C, H, W = x1.shape
    assert C == dim and x2.shape == x1.shape
    hw = H * W

    # Free contiguous reshapes -- no HBM-materializing channel concat.
    x1f = x1.reshape(B, dim, hw)
    x2f = x2.reshape(B, dim, hw)

    w1, b1, w2, b2 = params["w1"], params["b1"], params["w2"], params["b2"]
    hidden = w1.shape[1]
    assert w1.shape == (4 * dim, hidden) and w2.shape == (hidden, 2 * dim)
    b1r = b1.reshape(1, hidden)
    b2r = b2.reshape(1, 2 * dim)

    if tile_hw is None:
        tile_hw = _choose_tile_hw(hw, dim)
    assert tile_hw == hw or (tile_hw % 128 == 0 and tile_hw <= hw), tile_hw
    n_k = pl.cdiv(hw, tile_hw)

    # Explicit scoped-VMEM budget: 2 streamed inputs x 2 buffers x tile, the
    # resident weights (x2 conservatively in case Buffered(1) falls back),
    # the 4 scratch accumulators, plus headroom.
    tile_bytes = 4 * dim * tile_hw
    weight_bytes = 4 * (4 * dim * hidden + hidden + hidden * 2 * dim + 2 * dim)
    scratch_bytes = 4 * dim * 128 * 4
    vmem_limit = 2 * 2 * tile_bytes + 2 * weight_bytes + scratch_bytes + (8 << 20)
    vmem_limit = int(min(max(vmem_limit, 32 << 20), 64 << 20))

    kernel = functools.partial(
        _mlp_channel_weights_kernel, dim=dim, hw=hw, tile_hw=tile_hw)

    y = pl.pallas_call(
        kernel,
        out_shape=jax.ShapeDtypeStruct((B, 1, 2 * dim), jnp.float32),
        grid_spec=pltpu.PrefetchScalarGridSpec(
            num_scalar_prefetch=0,
            grid=(B, n_k),
            in_specs=[
                # Streaming x tiles: one batch row, full channels, tile_hw lanes.
                pl.BlockSpec((None, dim, tile_hw), lambda b, k: (b, 0, k)),
                pl.BlockSpec((None, dim, tile_hw), lambda b, k: (b, 0, k)),
                # Tiny MLP parameters: whole arrays, constant block index,
                # single-buffered (fetched once, stay resident in VMEM).
                _resident_spec((4 * dim, hidden)),
                _resident_spec((1, hidden)),
                _resident_spec((hidden, 2 * dim)),
                _resident_spec((1, 2 * dim)),
            ],
            out_specs=pl.BlockSpec((None, 1, 2 * dim), lambda b, k: (b, 0, 0)),
            scratch_shapes=[pltpu.VMEM((dim, 128), jnp.float32) for _ in range(4)],
        ),
        compiler_params=pltpu.CompilerParams(
            dimension_semantics=("parallel", "arbitrary"),
            vmem_limit_bytes=vmem_limit),
    )(x1f, x2f, w1, b1r, w2, b2r)

    # (B, 1, 2*dim) -> (B, 2, dim, 1, 1) -> (2, B, dim, 1, 1)
    return jnp.transpose(y.reshape(B, 2, dim, 1, 1), (1, 0, 2, 3, 4))


def _reference(x1, x2, params, dim):
    B = x1.shape[0]
    x = jnp.concatenate([x1, x2], axis=1)
    avg = jnp.mean(x, axis=(2, 3))
    mx = jnp.max(x, axis=(2, 3))
    y = jnp.concatenate([avg, mx], axis=1)
    h = jnp.maximum(y @ params["w1"] + params["b1"], 0.0)
    out = jax.nn.sigmoid(h @ params["w2"] + params["b2"])
    return jnp.transpose(out.reshape(B, 2, dim, 1, 1), (1, 0, 2, 3, 4))


if __name__ == "__main__":
    dim = 4
    reduction = 1
    B, H, W = 2, 16, 16
    hidden = dim * 4 // reduction

    key = jax.random.PRNGKey(0)
    k_x1, k_x2, k_w1, k_b1, k_w2, k_b2 = jax.random.split(key, 6)

    x1 = jax.random.normal(k_x1, (B, dim, H, W), dtype=jnp.float32)
    x2 = jax.random.normal(k_x2, (B, dim, H, W), dtype=jnp.float32)

    # Parameters stored (in, out), matching nn.Linear(dim*4, hidden) /
    # nn.Linear(hidden, dim*2) applied as y @ W + b.
    params = {
        "w1": jax.random.normal(k_w1, (dim * 4, hidden), dtype=jnp.float32) * 0.1,
        "b1": jax.random.normal(k_b1, (hidden,), dtype=jnp.float32) * 0.1,
        "w2": jax.random.normal(k_w2, (hidden, dim * 2), dtype=jnp.float32) * 0.1,
        "b2": jax.random.normal(k_b2, (dim * 2,), dtype=jnp.float32) * 0.1,
    }

    ref = _reference(x1, x2, params, dim)

    # 1) Auto tile (whole HW=256 in one 128-multiple block; nk=1).
    out_auto = jax.block_until_ready(mlp_channel_weights(x1, x2, params, dim))
    assert out_auto.shape == (2, B, dim, 1, 1), out_auto.shape
    assert jnp.allclose(out_auto, ref, atol=1e-5, rtol=1e-5), "mismatch (auto tile)"

    # 2) Forced tile_hw=128 exercises the multi-step init/accumulate/finalize path.
    out_tiled = jax.block_until_ready(
        mlp_channel_weights(x1, x2, params, dim, tile_hw=128))
    assert jnp.allclose(out_tiled, ref, atol=1e-5, rtol=1e-5), "mismatch (tiled)"

    # 3) Ragged spatial extent (HW=200): masked-tail path and single-block path.
    x1b = jax.random.normal(k_x1, (B, dim, 10, 20), dtype=jnp.float32)
    x2b = jax.random.normal(k_x2, (B, dim, 10, 20), dtype=jnp.float32)
    refb = _reference(x1b, x2b, params, dim)
    outb_masked = jax.block_until_ready(
        mlp_channel_weights(x1b, x2b, params, dim, tile_hw=128))
    assert jnp.allclose(outb_masked, refb, atol=1e-5, rtol=1e-5), "mismatch (masked tail)"
    outb_single = jax.block_until_ready(mlp_channel_weights(x1b, x2b, params, dim))
    assert jnp.allclose(outb_single, refb, atol=1e-5, rtol=1e-5), "mismatch (single block)"

    print("KERNEL_OK")
</pallas_src>

<mosaic_0001>
module attributes {stable_mosaic.version = 11 : i64} {
  func.func @_mlp_channel_weights_kernel(%arg0: i32, %arg1: i32, %arg2: memref<1x4x256xf32, #tpu.memory_space<vmem>>, %arg3: memref<1x4x256xf32, #tpu.memory_space<vmem>>, %arg4: memref<16x16xf32, #tpu.memory_space<vmem>>, %arg5: memref<1x16xf32, #tpu.memory_space<vmem>>, %arg6: memref<16x8xf32, #tpu.memory_space<vmem>>, %arg7: memref<1x8xf32, #tpu.memory_space<vmem>>, %arg8: memref<1x1x8xf32, #tpu.memory_space<vmem>>, %arg9: memref<4x128xf32, #tpu.memory_space<vmem>>, %arg10: memref<4x128xf32, #tpu.memory_space<vmem>>, %arg11: memref<4x128xf32, #tpu.memory_space<vmem>>, %arg12: memref<4x128xf32, #tpu.memory_space<vmem>>) attributes {dimension_semantics = [#tpu.dimension_semantics<parallel>, #tpu.dimension_semantics<arbitrary>], iteration_bounds = array<i64: 2, 1>, scalar_prefetch = 0 : i64, scratch_operands = 4 : i64, tpu.core_type = #tpu.core_type<tc>, window_params = [{transform_indices = @transform_0, window_bounds = array<i64: 1, 4, 256>}, {transform_indices = @transform_1, window_bounds = array<i64: 1, 4, 256>}, {pipeline_mode = #tpu.pipeline_mode<synchronous>, transform_indices = @transform_2, window_bounds = array<i64: 16, 16>}, {pipeline_mode = #tpu.pipeline_mode<synchronous>, transform_indices = @transform_3, window_bounds = array<i64: 1, 16>}, {pipeline_mode = #tpu.pipeline_mode<synchronous>, transform_indices = @transform_4, window_bounds = array<i64: 16, 8>}, {pipeline_mode = #tpu.pipeline_mode<synchronous>, transform_indices = @transform_5, window_bounds = array<i64: 1, 8>}, {transform_indices = @transform_6, window_bounds = array<i64: 1, 1, 8>}]} {
    %c0_i32 = arith.constant 0 : i32
    %0 = arith.cmpi eq, %arg1, %c0_i32 : i32
    %1 = arith.extui %0 : i1 to i32
    %c0_i32_0 = arith.constant 0 : i32
    %2 = arith.cmpi ne, %1, %c0_i32_0 : i32
    scf.if %2 {
      %cst = arith.constant 0.000000e+00 : f32
      %30 = vector.broadcast %cst : f32 to vector<4x128xf32>
      %c0_29 = arith.constant 0 : index
      %c0_30 = arith.constant 0 : index
      %31 = vector.load %arg9[%c0_29, %c0_30] : memref<4x128xf32, #tpu.memory_space<vmem>>, vector<4x128xf32>
      tpu.vector_store %arg9[%c0_29, %c0_30], %30 {strides = array<i32>} : memref<4x128xf32, #tpu.memory_space<vmem>>, vector<4x128xf32>,
      %cst_31 = arith.constant 0.000000e+00 : f32
      %32 = vector.broadcast %cst_31 : f32 to vector<4x128xf32>
      %c0_32 = arith.constant 0 : index
      %c0_33 = arith.constant 0 : index
      %33 = vector.load %arg11[%c0_32, %c0_33] : memref<4x128xf32, #tpu.memory_space<vmem>>, vector<4x128xf32>
      tpu.vector_store %arg11[%c0_32, %c0_33], %32 {strides = array<i32>} : memref<4x128xf32, #tpu.memory_space<vmem>>, vector<4x128xf32>,
      %cst_34 = arith.constant 0xFF800000 : f32
      %34 = vector.broadcast %cst_34 : f32 to vector<4x128xf32>
      %c0_35 = arith.constant 0 : index
      %c0_36 = arith.constant 0 : index
      %35 = vector.load %arg10[%c0_35, %c0_36] : memref<4x128xf32, #tpu.memory_space<vmem>>, vector<4x128xf32>
      tpu.vector_store %arg10[%c0_35, %c0_36], %34 {strides = array<i32>} : memref<4x128xf32, #tpu.memory_space<vmem>>, vector<4x128xf32>,
      %cst_37 = arith.constant 0xFF800000 : f32
      %36 = vector.broadcast %cst_37 : f32 to vector<4x128xf32>
      %c0_38 = arith.constant 0 : index
      %c0_39 = arith.constant 0 : index
      %37 = vector.load %arg12[%c0_38, %c0_39] : memref<4x128xf32, #tpu.memory_space<vmem>>, vector<4x128xf32>
      tpu.vector_store %arg12[%c0_38, %c0_39], %36 {strides = array<i32>} : memref<4x128xf32, #tpu.memory_space<vmem>>, vector<4x128xf32>,
    } else {
    }
    %c0 = arith.constant 0 : index
    %c0_1 = arith.constant 0 : index
    %3 = vector.load %arg9[%c0, %c0_1] : memref<4x128xf32, #tpu.memory_space<vmem>>, vector<4x128xf32>
    %c0_2 = arith.constant 0 : index
    %c0_3 = arith.constant 0 : index
    %4 = vector.load %arg10[%c0_2, %c0_3] : memref<4x128xf32, #tpu.memory_space<vmem>>, vector<4x128xf32>
    %c0_4 = arith.constant 0 : index
    %c0_5 = arith.constant 0 : index
    %c0_6 = arith.constant 0 : index
    %5 = vector.load %arg2[%c0_4, %c0_5, %c0_6] : memref<1x4x256xf32, #tpu.memory_space<vmem>>, vector<1x4x128xf32>
    %6 = vector.shape_cast %5 : vector<1x4x128xf32> to vector<4x128xf32>
    %7 = arith.addf %3, %6 : vector<4x128xf32>
    %8 = arith.maximumf %4, %6 : vector<4x128xf32>
    %c0_7 = arith.constant 0 : index
    %c0_8 = arith.constant 0 : index
    %c128 = arith.constant 128 : index
    %9 = vector.load %arg2[%c0_7, %c0_8, %c128] : memref<1x4x256xf32, #tpu.memory_space<vmem>>, vector<1x4x128xf32>
    %10 = vector.shape_cast %9 : vector<1x4x128xf32> to vector<4x128xf32>
    %11 = arith.addf %7, %10 : vector<4x128xf32>
    %12 = arith.maximumf %8, %10 : vector<4x128xf32>
    %c0_9 = arith.constant 0 : index
    %c0_10 = arith.constant 0 : index
    %13 = vector.load %arg9[%c0_9, %c0_10] : memref<4x128xf32, #tpu.memory_space<vmem>>, vector<4x128xf32>
    tpu.vector_store %arg9[%c0_9, %c0_10], %11 {strides = array<i32>} : memref<4x128xf32, #tpu.memory_space<vmem>>, vector<4x128xf32>,
    %c0_11 = arith.constant 0 : index
    %c0_12 = arith.constant 0 : index
    %14 = vector.load %arg10[%c0_11, %c0_12] : memref<4x128xf32, #tpu.memory_space<vmem>>, vector<4x128xf32>
    tpu.vector_store %arg10[%c0_11, %c0_12], %12 {strides = array<i32>} : memref<4x128xf32, #tpu.memory_space<vmem>>, vector<4x128xf32>,
    %c0_13 = arith.constant 0 : index
    %c0_14 = arith.constant 0 : index
    %15 = vector.load %arg11[%c0_13, %c0_14] : memref<4x128xf32, #tpu.memory_space<vmem>>, vector<4x128xf32>
    %c0_15 = arith.constant 0 : index
    %c0_16 = arith.constant 0 : index
    %16 = vector.load %arg12[%c0_15, %c0_16] : memref<4x128xf32, #tpu.memory_space<vmem>>, vector<4x128xf32>
    %c0_17 = arith.constant 0 : index
    %c0_18 = arith.constant 0 : index
    %c0_19 = arith.constant 0 : index
    %17 = vector.load %arg3[%c0_17, %c0_18, %c0_19] : memref<1x4x256xf32, #tpu.memory_space<vmem>>, vector<1x4x128xf32>
    %18 = vector.shape_cast %17 : vector<1x4x128xf32> to vector<4x128xf32>
    %19 = arith.addf %15, %18 : vector<4x128xf32>
    %20 = arith.maximumf %16, %18 : vector<4x128xf32>
    %c0_20 = arith.constant 0 : index
    %c0_21 = arith.constant 0 : index
    %c128_22 = arith.constant 128 : index
    %21 = vector.load %arg3[%c0_20, %c0_21, %c128_22] : memref<1x4x256xf32, #tpu.memory_space<vmem>>, vector<1x4x128xf32>
    %22 = vector.shape_cast %21 : vector<1x4x128xf32> to vector<4x128xf32>
    %23 = arith.addf %19, %22 : vector<4x128xf32>
    %24 = arith.maximumf %20, %22 : vector<4x128xf32>
    %c0_23 = arith.constant 0 : index
    %c0_24 = arith.constant 0 : index
    %25 = vector.load %arg11[%c0_23, %c0_24] : memref<4x128xf32, #tpu.memory_space<vmem>>, vector<4x128xf32>
    tpu.vector_store %arg11[%c0_23, %c0_24], %23 {strides = array<i32>} : memref<4x128xf32, #tpu.memory_space<vmem>>, vector<4x128xf32>,
    %c0_25 = arith.constant 0 : index
    %c0_26 = arith.constant 0 : index
    %26 = vector.load %arg12[%c0_25, %c0_26] : memref<4x128xf32, #tpu.memory_space<vmem>>, vector<4x128xf32>
    tpu.vector_store %arg12[%c0_25, %c0_26], %24 {strides = array<i32>} : memref<4x128xf32, #tpu.memory_space<vmem>>, vector<4x128xf32>,
    %c0_i32_27 = arith.constant 0 : i32
    %27 = arith.cmpi eq, %arg1, %c0_i32_27 : i32
    %28 = arith.extui %27 : i1 to i32
    %c0_i32_28 = arith.constant 0 : i32
    %29 = arith.cmpi ne, %28, %c0_i32_28 : i32
    scf.if %29 {
      %c0_29 = arith.constant 0 : index
      %c0_30 = arith.constant 0 : index
      %30 = vector.load %arg9[%c0_29, %c0_30] : memref<4x128xf32, #tpu.memory_space<vmem>>, vector<4x128xf32>
      %cst = arith.constant dense<0.000000e+00> : vector<4xf32>
      %31 = vector.multi_reduction <add>, %30, %cst [1] : vector<4x128xf32> to vector<4xf32>
      %32 = vector.shape_cast %31 : vector<4xf32> to vector<4x1xf32>
      %cst_31 = arith.constant 3.906250e-03 : f32
      %33 = vector.broadcast %cst_31 : f32 to vector<4x1xf32>
      %34 = arith.mulf %32, %33 : vector<4x1xf32>
      %c0_32 = arith.constant 0 : index
      %c0_33 = arith.constant 0 : index
      %35 = vector.load %arg10[%c0_32, %c0_33] : memref<4x128xf32, #tpu.memory_space<vmem>>, vector<4x128xf32>
      %cst_34 = arith.constant dense<0xFF800000> : vector<4xf32>
      %36 = vector.multi_reduction <maximumf>, %35, %cst_34 [1] : vector<4x128xf32> to vector<4xf32>
      %37 = vector.shape_cast %36 : vector<4xf32> to vector<4x1xf32>
      %c0_35 = arith.constant 0 : index
      %c0_36 = arith.constant 0 : index
      %38 = vector.load %arg11[%c0_35, %c0_36] : memref<4x128xf32, #tpu.memory_space<vmem>>, vector<4x128xf32>
      %cst_37 = arith.constant dense<0.000000e+00> : vector<4xf32>
      %39 = vector.multi_reduction <add>, %38, %cst_37 [1] : vector<4x128xf32> to vector<4xf32>
      %40 = vector.shape_cast %39 : vector<4xf32> to vector<4x1xf32>
      %cst_38 = arith.constant 3.906250e-03 : f32
      %41 = vector.broadcast %cst_38 : f32 to vector<4x1xf32>
      %42 = arith.mulf %40, %41 : vector<4x1xf32>
      %c0_39 = arith.constant 0 : index
      %c0_40 = arith.constant 0 : index
      %43 = vector.load %arg12[%c0_39, %c0_40] : memref<4x128xf32, #tpu.memory_space<vmem>>, vector<4x128xf32>
      %cst_41 = arith.constant dense<0xFF800000> : vector<4xf32>
      %44 = vector.multi_reduction <maximumf>, %43, %cst_41 [1] : vector<4x128xf32> to vector<4xf32>
      %45 = vector.shape_cast %44 : vector<4xf32> to vector<4x1xf32>
      %46 = tpu.concatenate %34, %42, %37, %45 in 0 : vector<4x1xf32>, vector<4x1xf32>, vector<4x1xf32>, vector<4x1xf32> -> vector<16x1xf32>
      %47 = tpu.transpose %46, [1, 0] : vector<16x1xf32> -> vector<1x16xf32>
      %c0_42 = arith.constant 0 : index
      %c0_43 = arith.constant 0 : index
      %48 = vector.load %arg4[%c0_42, %c0_43] : memref<16x16xf32, #tpu.memory_space<vmem>>, vector<16x16xf32>
      %cst_44 = arith.constant dense<0.000000e+00> : vector<1x16xf32>
      %49 = tpu.matmul %47, %48, %cst_44 {dimension_numbers = #tpu.dot_dimension_numbers<[1], [0], [0], [1], [0, 0, 1, 1], [], []>} : vector<1x16xf32>, vector<16x16xf32>, vector<1x16xf32> -> vector<1x16xf32>
      %c0_45 = arith.constant 0 : index
      %c0_46 = arith.constant 0 : index
      %50 = vector.load %arg5[%c0_45, %c0_46] : memref<1x16xf32, #tpu.memory_space<vmem>>, vector<1x16xf32>
      %51 = arith.addf %49, %50 : vector<1x16xf32>
      %cst_47 = arith.constant 0.000000e+00 : f32
      %52 = vector.broadcast %cst_47 : f32 to vector<1x16xf32>
      %53 = arith.maximumf %51, %52 : vector<1x16xf32>
      %c0_48 = arith.constant 0 : index
      %c0_49 = arith.constant 0 : index
      %54 = vector.load %arg6[%c0_48, %c0_49] : memref<16x8xf32, #tpu.memory_space<vmem>>, vector<16x8xf32>
      %cst_50 = arith.constant dense<0.000000e+00> : vector<1x8xf32>
      %55 = tpu.matmul %53, %54, %cst_50 {dimension_numbers = #tpu.dot_dimension_numbers<[1], [0], [0], [1], [0, 0, 1, 1], [], []>} : vector<1x16xf32>, vector<16x8xf32>, vector<1x8xf32> -> vector<1x8xf32>
      %c0_51 = arith.constant 0 : index
      %c0_52 = arith.constant 0 : index
      %56 = vector.load %arg7[%c0_51, %c0_52] : memref<1x8xf32, #tpu.memory_space<vmem>>, vector<1x8xf32>
      %57 = arith.addf %55, %56 : vector<1x8xf32>
      %58 = arith.negf %57 : vector<1x8xf32>
      %59 = math.exp %58 : vector<1x8xf32>
      %cst_53 = arith.constant 1.000000e+00 : f32
      %60 = vector.broadcast %cst_53 : f32 to vector<1x8xf32>
      %61 = arith.addf %60, %59 : vector<1x8xf32>
      %62 = arith.divf %60, %61 : vector<1x8xf32>
      %c0_54 = arith.constant 0 : index
      %c0_55 = arith.constant 0 : index
      %c0_56 = arith.constant 0 : index
      %63 = vector.load %arg8[%c0_54, %c0_55, %c0_56] : memref<1x1x8xf32, #tpu.memory_space<vmem>>, vector<1x1x8xf32>
      %64 = vector.shape_cast %63 : vector<1x1x8xf32> to vector<1x8xf32>
      %65 = vector.shape_cast %62 : vector<1x8xf32> to vector<1x1x8xf32>
      tpu.vector_store %arg8[%c0_54, %c0_55, %c0_56], %65 {strides = array<i32>} : memref<1x1x8xf32, #tpu.memory_space<vmem>>, vector<1x1x8xf32>,
    } else {
    }
    return
  }
  func.func @transform_0(%arg0: i32, %arg1: i32) -> (i32, i32, i32) {
    %c0_i32 = arith.constant 0 : i32
    %c0_i32_0 = arith.constant 0 : i32
    return %arg0, %c0_i32, %arg1 : i32, i32, i32
  }
  func.func @transform_1(%arg0: i32, %arg1: i32) -> (i32, i32, i32) {
    %c0_i32 = arith.constant 0 : i32
    %c0_i32_0 = arith.constant 0 : i32
    return %arg0, %c0_i32, %arg1 : i32, i32, i32
  }
  func.func @transform_2(%arg0: i32, %arg1: i32) -> (i32, i32) {
    %c0_i32 = arith.constant 0 : i32
    %c0_i32_0 = arith.constant 0 : i32
    %c0_i32_1 = arith.constant 0 : i32
    return %c0_i32, %c0_i32_0 : i32, i32
  }
  func.func @transform_3(%arg0: i32, %arg1: i32) -> (i32, i32) {
    %c0_i32 = arith.constant 0 : i32
    %c0_i32_0 = arith.constant 0 : i32
    %c0_i32_1 = arith.constant 0 : i32
    return %c0_i32, %c0_i32_0 : i32, i32
  }
  func.func @transform_4(%arg0: i32, %arg1: i32) -> (i32, i32) {
    %c0_i32 = arith.constant 0 : i32
    %c0_i32_0 = arith.constant 0 : i32
    %c0_i32_1 = arith.constant 0 : i32
    return %c0_i32, %c0_i32_0 : i32, i32
  }
  func.func @transform_5(%arg0: i32, %arg1: i32) -> (i32, i32) {
    %c0_i32 = arith.constant 0 : i32
    %c0_i32_0 = arith.constant 0 : i32
    %c0_i32_1 = arith.constant 0 : i32
    return %c0_i32, %c0_i32_0 : i32, i32
  }
  func.func @transform_6(%arg0: i32, %arg1: i32) -> (i32, i32, i32) {
    %c0_i32 = arith.constant 0 : i32
    %c0_i32_0 = arith.constant 0 : i32
    %c0_i32_1 = arith.constant 0 : i32
    return %arg0, %c0_i32, %c0_i32_0 : i32, i32, i32
  }
}

</mosaic_0001>

<bundles_post_ra>
// kernel: tpu_custom_call.1
= control target key start
LH: loop header
LB: loop body
LE: loop exit
PB: predicated region body
PF: predicated region fallthrough
CT: control target
= control target key end

     0   :  { %s1263_s0 = inlined_call_operand.vmem [shape: f32[2,4,256], index: 0, kind: input, shape index: {}]   ;;  %s1264_s1 = inlined_call_operand.hbm [shape: f32[2,4,256], index: 1, kind: input, shape index: {}]   ;;  %s1265_s2 = inlined_call_operand.hbm [shape: f32[16,16], index: 2, kind: input, shape index: {}]   ;;  %s1266_s3 = inlined_call_operand.vmem [shape: f32[1,16], index: 3, kind: input, shape index: {}]   ;;  %s1267_s4 = inlined_call_operand.vmem [shape: f32[16,8], index: 4, kind: input, shape index: {}]   ;;  %s1268_s5 = inlined_call_operand.vmem [shape: f32[1,8], index: 5, kind: input, shape index: {}]   ;;  %s1269_s6 = inlined_call_operand.hbm [shape: f32[2,1,8], index: 6, kind: output, shape index: {}]  }
   0x1   :  { %1274 = sst [smem:[#allocation15_spill]] %s1265_s2 }
   0x2   :  { %11 = vsyncpa [#allocation7], 0 }
   0x3   :  { %13 = vsyncpa [#allocation7 + $0x1], 0 }
   0x4   :  { %14 = vsyncpa [#allocation10], 0 }
   0x5   :  { %15 = vsyncpa [#allocation8], 0 }
   0x6   :  { %17 = vsyncpa [#allocation8 + $0x1], 0  ;;  %s1025_s21 = smov 0   ;;  %s1027_s22 = smov 0  }
   0x7   :  { %s1029_s23 = smov 0   ;;  %s1031_s24 = smov 0  }
   0x8   :  { %s1033_s25 = smov 0   ;;  %s1035_s26 = smov 0  }
   0x9 LB: > { %s705_s27 = sadd.s32 4294967295, %s979_s26   ;;  %s706_s28 = sadd.s32 4294967294, %s979_s26   ;;  %s979_s26 = sphi %s1035_s26, %s23_s26   ;;  %s975_s25 = sphi %s1033_s25, %s1295_s25   ;;  %s971_s24 = sphi %s1031_s24, %s1294_s24   ;;  %s967_s23 = sphi %s1029_s23, %s1293_s23   ;;  %s963_s22 = sphi %s1027_s22, %s1292_s22   ;;  %s959_s21 = sphi %s1025_s21, %s1291_s21  }
   0xa   : > { %p85_p0 = scmp.ne.s32.totalorder %s963_s22, %s959_s21  ;;  %p1059_p1 = scmp.eq.s32.totalorder %s705_s27, 0 }
   0xb   : > { %p1063_p2 = scmp.eq.s32.totalorder %s705_s27, 1  ;;  %p199_p3 = scmp.eq.s32.totalorder %s706_s28, 1 }
   0xc   : > { %s1275_s29 = scalar_select %p1059_p1, 1, 0 }
   0xd   : > { %s1276_s30 = scalar_select %p1063_p2, 1, 0 }
   0xe   : > { %p1069_p4 = por %p1059_p1, %p85_p0  ;;  %p707_p5 = scmp.ge.s32.totalorder %s979_s26, 1 }
   0xf   : > { %p1074_p6 = por %p199_p3, %p85_p0  ;;  %p206_p7 = scmp.lt.s32.totalorder %s979_s26, 3 }
  0x10   : > { %s1277_s7 = scalar_select %p1069_p4, 1, 0 }
  0x11   : > { %s1278_s8 = scalar_select %p1074_p6, 1, 0 }
  0x12   : > { %p1079_p8 = pnand %p707_p5, %p206_p7  ;;  %s981_s10 = smov [#allocation9]  }
  0x13   : > { %s218_s11 = sshll.u32 %s981_s10, 4  ;;  %s35_s13 = sadd.s32 1, %s975_s25  ;;  %s219_s11 = int_to_ptr.vmem [resolvable:$true] %s218_s11 }
  0x14   : > { %s1279_s9 = scalar_select %p1079_p8, 1, 0 }
  0x15   : > { %p760_p9 = pneg %p1079_p8  ;;  %s1281_s2 = sld [smem:[#allocation15_spill]] }
  0x17   : > { %p1088_p11 = pnand %p760_p9, %p1059_p1 }
  0x19   : > { %p837_p13 = pneg %p1088_p11 }
  0x1b   : > { %s835_s16 = scalar_lea.hbm %s1281_s2, 256 }
  0x1c   : > { %p836_p12 = scmp.ne.s32.totalorder %s1281_s2, %s835_s16  ;;  %p842_p5 = scmp.lt.u32.totalorder %s835_s16, %s1281_s2 }
  0x1e   : > { %p838_p0 = pnand %p837_p13, %p836_p12 }
  0x20   : > { %p839_p3 = pneg %p838_p0 }
  0x22   : > { %p844_p7 = pnand %p842_p5, %p839_p3 }
  0x24   : > { %847 = shalt.err (!%p844_p7)
}
  0x25   : > { %s848_s27 = scalar_lea.vmem %s219_s11, 256  ;;  %p856_p1 = scmp.lt.s32.totalorder %s219_s11, %s219_s11 }
  0x26   : > { %p849_p9 = scmp.ne.s32.totalorder %s219_s11, %s848_s27  ;;  %p857_p4 = scmp.lt.s32.totalorder %s848_s27, %s848_s27 }
  0x28   : > { %p851_p10 = pnand %p849_p9, %p837_p13  ;;  %p858_p8 = por %p857_p4, %p856_p1 }
  0x2a   : > { %p852_p6 = pneg %p851_p10 }
  0x2c   : > { %p859_p2 = pnand %p858_p8, %p852_p6 }
  0x2e   : > { %862 = shalt.err (!%p859_p2)
}
  0x2f   : > { %s982_s28 = smov 128   ;;  %s983_s10 = smov 8  }
  0x30   : > { %763 = dma.hbm_to_vmem [thread:$0]  (!%p1088_p11), %s1281_s2, 256, %s219_s11, [#allocation10], %s982_s28, %s982_s28, %s983_s10  }
  0x31   : > { %p37_p1 = scmp.ge.s32.totalorder %s35_s13, 2  ;;  %s72_s16 = sadd.s32 1, %s967_s23 }
  0x32   : > { %p79_p2 = scmp.ne.s32.totalorder %s967_s23, %s963_s22  ;;  %p80_p4 = scmp.eq.s32.totalorder %s979_s26, 0 }
  0x33   : > { %s1297_s13 = smov (%p37_p1, %s35_s13), 0  ;;  %p1283_p8 = scmp.ne.s32.totalorder %s1276_s30, 0 }
  0x34   : > { %p1115_p6 = por %p80_p4, %p79_p2  ;;  %s67_s12 = ssub.s32 %s975_s25, %s1297_s13 }
  0x35   : > { %p1121_p10 = por %p1283_p8, %p79_p2  ;;  %p773_p12 = scmp.lt.s32.totalorder %s979_s26, 2 }
  0x36   : > { %p70_p11 = scmp.eq.s32.totalorder %s67_s12, 0  ;;  %s254_s11 = sand.u32 1, %s967_s23  }
  0x37   : > { %s710_s19 = sshll.u32 %s254_s11, 3  ;;  %s724_s27 = sshll.u32 %s975_s25, 7 }
  0x38   : > { %s1130_s20 = scalar_select %p70_p11, %s967_s23, %s72_s16  }
  0x39   : > { %s1136_s14 = scalar_lea.hbm %s1264_s1, %s724_s27  ;;  %s258_s30 = scalar_lea.vmem [#allocation6], %s710_s19 }
  0x3a   : > { %s268_s15 = sshll.u32 %s258_s30, 4  ;;  %p1142_p13 = pnand %p773_p12, %p1115_p6  ;;  %s1138_s15 = int_to_ptr.vmem [resolvable:$true] %s268_s15 }
  0x3b   : > { %s255_s16 = scalar_lea.sflag [#allocation7], %s254_s11  ;;  %s863_s2 = scalar_lea.hbm %s1136_s14, 128 }
  0x3c   : > { %p864_p0 = scmp.ne.s32.totalorder %s1136_s14, %s863_s2  ;;  %p865_p3 = pneg %p1142_p13 }
  0x3d   : > { %s868_s28 = scalar_lea.hbm %s1264_s1, 256  ;;  %p869_p9 = scmp.lt.u32.totalorder %s1136_s14, %s1264_s1 }
  0x3e   : > { %p866_p5 = pnand %p865_p3, %p864_p0  ;;  %p870_p1 = scmp.lt.u32.totalorder %s868_s28, %s863_s2 }
  0x3f   : > { %p872_p4 = scmp.lt.u32.totalorder %s863_s2, %s1136_s14 }
  0x40   : > { %p867_p7 = pneg %p866_p5  ;;  %p871_p2 = por %p870_p1, %p869_p9 }
  0x42   : > { %p873_p6 = por %p872_p4, %p871_p2 }
  0x44   : > { %p874_p8 = pnand %p873_p6, %p867_p7 }
  0x46   : > { %877 = shalt.err (!%p874_p8)
}
  0x47   : > { %s878_s11 = scalar_lea.vmem %s1138_s15, 128  ;;  %s984_s30 = smov [#allocation6]  }
  0x48   : > { %p879_p12 = scmp.ne.s32.totalorder %s1138_s15, %s878_s11  ;;  %s883_s19 = sshll.u32 %s984_s30, 4  ;;  %s884_s19 = int_to_ptr.vmem [resolvable:$false] %s883_s19 }
  0x49   : > { %s885_s27 = scalar_lea.vmem %s884_s19, 256  ;;  %p886_p5 = scmp.lt.s32.totalorder %s1138_s15, %s884_s19 }
  0x4a   : > { %p881_p11 = pnand %p879_p12, %p865_p3  ;;  %p887_p9 = scmp.lt.s32.totalorder %s885_s27, %s878_s11 }
  0x4c   : > { %p882_p0 = pneg %p881_p11  ;;  %p888_p1 = por %p887_p9, %p886_p5 }
  0x4e   : > { %p889_p2 = pnand %p888_p1, %p882_p0 }
  0x50   : > { %892 = shalt.err (!%p889_p2)
}
  0x51   : > { %767 = dma.hbm_to_vmem [thread:$0]  (!%p1142_p13), %s1136_s14, 128, %s1138_s15, %s255_s16  }
  0x52   : > { %p1286_p7 = scmp.ne.s32.totalorder %s1279_s9, 0 }
  0x53   : > { %s1174_s2 = sand.u32 (!%p1286_p7), 1, %s963_s22   ;;  %p1287_p3 = scmp.ne.s32.totalorder (!%p1286_p7), %s1277_s7, 0 }
  0x54   : > { %277 = sbr.rel (%p1286_p7) target bundleno = 865 (0x361), region = 44  ;;  %s714_s28 = sshll.u32 (!%p1286_p7), %s1174_s2, 3 }
  0x55   : > { %s280_s17 = scalar_lea.sflag (!%p1286_p7), [#allocation7], %s1174_s2  ;;  %s283_s10 = scalar_lea.vmem (!%p1286_p7), [#allocation6], %s714_s28 }
  0x5b   : > { %946 = dma.done.wait (%p1287_p3), %s280_s17, 128  }
  0x5c   : > { %948 = vsyncadd (%p1287_p3), %s280_s17, 4294967168  ;;  %p1288_p4 = scmp.ne.s32.totalorder %s1275_s29, 0 }
  0x5e   : > { %950 = dma.done.wait (%p1288_p4), [#allocation10], 256  }
  0x5f   : > { %952 = vsyncadd (%p1288_p4), [#allocation10], 4294967040  ;;  %p325_p13 = scmp.lt.s32.totalorder %s971_s24, 1  ;;  %v985_v0 = vmov 0.0   ;;  %v986_v1 = vmov -inf   ;;  %vm367_vm0 = vcmask 1043456  }
  0x60   : > { %340 = vst [vmem:[#allocation4] sm:$0xf] %v985_v0  ;;  %339 = vst [vmem:[#allocation2] sm:$0xf] %v985_v0  ;;  %v355_v2 = vld [vmem:[%s283_s10] sm:$0xf] }
  0x61   : > { %342 = vst [vmem:[#allocation5] sm:$0xf] %v986_v1  ;;  %341 = vst [vmem:[#allocation3] sm:$0xf] %v986_v1  ;;  %s326_s9 = scalar_select %p325_p13, %s971_s24, 1  ;;  %v425_v26 = vld [vmem:[#allocation9] sm:$0xff] }
  0x62   : > { %v358_v3 = vld [vmem:[%s283_s10 + $0x4] sm:$0xf]  ;;  %v426_v27 = vld [vmem:[#allocation9 + $0x8] sm:$0xff]  ;;  %v987_v28 = vmov 0.0|0.0   ;;  %vm988_vm1 = vmmov 0   ;;  %vm428_vm2 = vcmask 130048  }
  0x63   : > { %s725_s14 = sshll.u32 %s326_s9, 3  ;;  %746 = vmatprep.subr.bf16.mxu0 %v987_v28  ;;  %v747_v29 = vpack.c.bf16 %v426_v27, %v425_v26  ;;  %736 = vmatprep.mubr.msk.f32.mxu0 %vm988_vm1, %v985_v0  ;;  %v503_v41 = vld [vmem:[%s1267_s4] sm:$0xff]  ;;  %v504_v42 = vld [vmem:[%s1267_s4 + $0x8] sm:$0xff]  ;;  %s721_s10 = sshll.u32 %s971_s24, 4  ;;  %vm585_vm3 = vcmask 57344  }
  0x64   : > { %s332_s12 = scalar_lea.vmem %s1263_s0, %s725_s14  ;;  %749 = vmatprep.subr.bf16.mxu1 %v987_v28  ;;  %743 = vmatprep.mubr.msk.f32.mxu1 %vm988_vm1, %v985_v0  ;;  %v750_v43 = vpack.c.bf16 %v504_v42, %v503_v41  ;;  %v427_v44 = vld [vmem:[%s1266_s3] sm:$0x1]  ;;  %s323_s9 = scalar_lea.vmem [#allocation11], %s1174_s2 }
  0x65   : > { %v345_v4 = vld [vmem:[%s332_s12] sm:$0xf]  ;;  %v348_v11 = vld [vmem:[%s332_s12 + $0x4] sm:$0xf]  ;;  %748 = vmatpush3.bf16.msra.mxu0 %v747_v29  ;;  %s600_s14 = sshll.u32 %s323_s9, 4  ;;  %s1214_s12 = scalar_lea.hbm %s1269_s6, %s721_s10  ;;  %s1216_s14 = int_to_ptr.vmem [resolvable:$true] %s600_s14 }
  0x66   : > { %751 = vmatpush3.bf16.msra.mxu1 %v750_v43  ;;  %v505_v49 = vld [vmem:[%s1268_s5] sm:$0x1]  ;;  %s588_s29 = scalar_lea.sflag [#allocation8], %s1174_s2  ;;  %s893_s16 = scalar_lea.vmem %s1216_s14, 16 }
  0x67   : > { %v353_v5 = vld [vmem:[#allocation4] sm:$0xf]  ;;  %v343_v7 = vld [vmem:[#allocation2] sm:$0xf]  ;;  %p894_p6 = scmp.ne.s32.totalorder %s1216_s14, %s893_s16  ;;  %s989_s24 = smov [#allocation11]  }
  0x68   : > { %v354_v6 = vld [vmem:[#allocation5] sm:$0xf]  ;;  %v356_v8 = vadd.f32 %v355_v2, %v353_v5  ;;  %v346_v10 = vadd.f32 %v345_v4, %v343_v7  ;;  %v344_v12 = vld [vmem:[#allocation3] sm:$0xf]  ;;  %s897_s11 = sshll.u32 %s989_s24, 4  ;;  %s898_s11 = int_to_ptr.vmem [resolvable:$false] %s897_s11 }
  0x69   : > { %v357_v9 = vmax.f32 %v354_v6, %v355_v2  ;;  %v347_v13 = vmax.f32 %v344_v12, %v345_v4  ;;  %p895_p8 = pnand %p894_p6, %p1121_p10  ;;  %s899_s30 = scalar_lea.vmem %s898_s11, 32 }
  0x6a   : > { %v359_v14 = vadd.f32 %v358_v3, %v356_v8  ;;  %v349_v16 = vadd.f32 %v348_v11, %v346_v10  ;;  %p900_p11 = scmp.lt.s32.totalorder %s1216_s14, %s898_s11  ;;  %p901_p0 = scmp.lt.s32.totalorder %s899_s30, %s893_s16 }
  0x6b   : > { %v360_v15 = vmax.f32 %v357_v9, %v358_v3  ;;  %v350_v17 = vmax.f32 %v347_v13, %v348_v11  ;;  %p896_p12 = pneg %p895_p8 }
  0x6c   : > { %361 = vst [vmem:[#allocation4] sm:$0xf] %v359_v14  ;;  %351 = vst [vmem:[#allocation2] sm:$0xf] %v349_v16  ;;  %p902_p5 = por %p901_p0, %p900_p11 }
  0x6d   : > { %362 = vst [vmem:[#allocation5] sm:$0xf] %v360_v15  ;;  %352 = vst [vmem:[#allocation3] sm:$0xf] %v350_v17 }
  0x6e   : > { %p903_p9 = pnand %p902_p5, %p896_p12 }
  0x73   : > { %v376_v18 = vld [vmem:[#allocation4] sm:$0xf]  ;;  %v366_v20 = vld [vmem:[#allocation2] sm:$0xf] }
  0x74   : > { %v381_v19 = vld [vmem:[#allocation5] sm:$0xf]  ;;  %v377_v21 = vsel %vm367_vm0, %v376_v18, 0.0  ;;  %v372_v23 = vld [vmem:[#allocation3] sm:$0xf]  ;;  %v368_v24 = vsel %vm367_vm0, %v366_v20, 0.0 }
  0x75   : > { %v382_v22 = vsel %vm367_vm0, %v381_v19, -inf  ;;  %378 = vadd.xlane.f32.xlu0 %v377_v21  ;;  %v373_v25 = vsel %vm367_vm0, %v372_v23, -inf }
  0x76   : > { %383 = vmax.xlane.f32.xlu1 %v382_v22 }
  0x79   : > { %369 = vadd.xlane.f32.xlu0 %v368_v24 }
  0x7a   : > { %374 = vmax.xlane.f32.xlu1 %v373_v25 }
 0x102   : > { %v379_v30 = vpop.xlane.xlu0 %378 }
 0x103   : > { %v380_v31 = vmul.f32 0.00390625, %v379_v30  ;;  %v384_v32 = vpop.xlane.xlu1 %383 }
 0x104   : > { %v389_v36 = vrot.slane %v384_v32, 4 }
 0x105   : > { %v386_v34 = vrot.slane %v380_v31, 4 }
 0x106   : > { %v370_v33 = vpop.xlane.xlu0 %369 }
 0x107   : > { %v371_v35 = vmul.f32 0.00390625, %v370_v33  ;;  %v375_v38 = vpop.xlane.xlu1 %374 }
 0x108   : > { %v392_v39 = vsel %vm367_vm0, %v375_v38, %v389_v36 }
 0x109   : > { %v391_v37 = vsel %vm367_vm0, %v371_v35, %v386_v34 }
 0x10a   : > { %393 = vxpose.xlu0.b32.start [1/2] (short) (narrow) %v391_v37, 8 }
 0x10e   : > { %394 = vxpose.xlu0.b32.end [2/2] (short) (narrow) %v392_v39, 8 }
 0x18a   : > { %v409_v40 = vpop.trf.xlu0 }
 0x18b   : > { %737 = vmatmul.mubr.msk.f32.vlgmr.msra.gmra.mrb[0].mxu0 %vm428_vm2, %v409_v40 }
 0x25e   : > { %v498_v45 = vpop.f32.mrb[0].mxu0 }
 0x25f   : > { %v499_v46 = vadd.f32 %v498_v45, %v427_v44  ;;  %v738_v47 = vpop.f32.mrb[1].mxu0 }
 0x261   : > { %v502_v48 = vmax.f32 %v499_v46, 0.0 }
 0x263   : > { %744 = vmatmul.mubr.msk.f32.vlgmr.msra.gmra.mrb[0].mxu1 %vm428_vm2, %v502_v48 }
 0x336   : > { %v575_v50 = vpop.f32.mrb[0].mxu1 }
 0x337   : > { %v576_v51 = vadd.f32 %v575_v50, %v505_v49  ;;  %v745_v52 = vpop.f32.mrb[1].mxu1 }
 0x339   : > { %v720_v53 = vmul.f32 -1.442695, %v576_v51 }
 0x33b   : > { %831 = vpow2.f32 %v720_v53 }
 0x345   : > { %v832_v54 = vpop.eup %831 }
 0x346   : > { %v582_v55 = vadd.f32 1.0, %v832_v54 }
 0x348   : > { %833 = vrcp.f32 %v582_v55 }
 0x352   : > { %v834_v56 = vpop.eup %833 }
 0x353   : > { %586 = vst.msk [vmem:[%s323_s9] sm:$0x1] %vm585_vm3, %v834_v56 }
 0x354   : > { %906 = shalt.err (!%p903_p9)
}
 0x355   : > { %s907_s2 = scalar_lea.hbm %s1214_s12, 16  ;;  %s911_s28 = scalar_lea.hbm %s1269_s6, 32 }
 0x356   : > { %p908_p1 = scmp.ne.s32.totalorder %s1214_s12, %s907_s2  ;;  %p912_p3 = scmp.lt.u32.totalorder %s1214_s12, %s1269_s6 }
 0x357   : > { %p913_p4 = scmp.lt.u32.totalorder %s911_s28, %s907_s2  ;;  %p915_p6 = scmp.lt.u32.totalorder %s907_s2, %s1214_s12 }
 0x358   : > { %p909_p2 = pnand %p908_p1, %p1121_p10 }
 0x359   : > { %p914_p13 = por %p913_p4, %p912_p3 }
 0x35a   : > { %p910_p7 = pneg %p909_p2 }
 0x35b   : > { %p916_p8 = por %p915_p6, %p914_p13 }
 0x35d   : > { %p917_p12 = pnand %p916_p8, %p910_p7 }
 0x35f   : > { %920 = shalt.err (!%p917_p12)
}
 0x360   : > { %758 = dma.vmem_to_hbm [thread:$0]  (%p1121_p10), %s1216_s14, 16, %s1214_s12, %s588_s29  }
 0x361 PF: > { %s612_s9 = sand.u32 1, %s959_s21   ;;  %p1289_p11 = scmp.ne.s32.totalorder %s1278_s8, 0 }
 0x362   : > { %p1290_p0 = scmp.ge.s32.totalorder %s979_s26, 2  ;;  %s613_s15 = scalar_lea.sflag [#allocation8], %s612_s9 }
 0x364   : > { %p769_p5 = pnand %p1290_p0, %p1289_p11 }
 0x366   : > { %954 = dma.done.wait (!%p769_p5), %s613_s15, 16  }
 0x367   : > { %956 = vsyncadd (!%p769_p5), %s613_s15, 4294967280  ;;  %s23_s26 = sadd.s32 1, %s979_s26   ;;  %s1291_s21 = smov %s963_s22 }
 0x368   : > { %p20_p9 = scmp.ge.s32.totalorder %s23_s26, 4   ;;  %s1292_s22 = smov %s967_s23 }
 0x369   : > { %s1293_s23 = smov %s1130_s20  ;;  %s1294_s24 = smov %s975_s25 }
 0x36a   : > { %s1295_s25 = smov %s1297_s13  ;;  %22 = sbr.rel (!%p20_p9) target bundleno = 9 (0x9), region = 104 }
 0x371   :  { %617 = vsyncpa [#allocation7], 1 }
 0x372   :  { %619 = vsyncpa [#allocation7 + $0x1], 1 }
 0x373   :  { %620 = vsyncpa [#allocation10], 1 }
 0x374   :  { %621 = vsyncpa [#allocation8], 1 }
 0x375   :  { %623 = vsyncpa [#allocation8 + $0x1], 1 }

</bundles_post_ra>
